<compile_context>
chip_gen: v7x
topology: tpu7x:2x2x1
jax: 0.10.0
libtpu: 0.0.40
codegen_flags: <defaults>
</compile_context>

<pallas_src>
import jax
import jax.numpy as jnp
from jax.experimental import pallas as pl
from jax.experimental.pallas import tpu as pltpu

_LANES = 128
_SUBLANES = 8
_ROW_TILE = 1024  # rows/grid-step for large inputs: 1024*128*4B = 512 KiB/buffer


def _hardsigmoid_kernel(x_ref, o_ref):
    # Hardsigmoid: relu6(x + 3) / 6 == clip(x/6 + 0.5, 0, 1).
    # Upcast to f32 for the arithmetic (v5e has no bf16 VPU), cast on store.
    x = x_ref[...].astype(jnp.float32)
    y = jnp.clip(x * (1.0 / 6.0) + 0.5, 0.0, 1.0)
    o_ref[...] = y.astype(o_ref.dtype)


def hardsigmoid(x):
    """Elementwise Hardsigmoid for any-shape float array; preserves shape/dtype."""
    orig_shape = x.shape
    dtype = x.dtype
    n = x.size

    if n <= _ROW_TILE * _LANES:
        # Small path: one un-gridded call, whole array resident in VMEM.
        tile_elems = _SUBLANES * _LANES  # pad so the 2D view is (8k, 128)
        n_pad = ((n + tile_elems - 1) // tile_elems) * tile_elems
        xf = x.reshape(-1)
        if n_pad != n:
            xf = jnp.pad(xf, (0, n_pad - n))
        x2d = xf.reshape(n_pad // _LANES, _LANES)

        out2d = pl.pallas_call(
            _hardsigmoid_kernel,
            out_shape=jax.ShapeDtypeStruct(x2d.shape, dtype),
            in_specs=[pl.BlockSpec(memory_space=pltpu.MemorySpace.VMEM)],
            out_specs=pl.BlockSpec(memory_space=pltpu.MemorySpace.VMEM),
        )(x2d)
    else:
        # Large path: tile over rows, let megacore shard the parallel axis.
        tile_elems = _ROW_TILE * _LANES
        n_pad = ((n + tile_elems - 1) // tile_elems) * tile_elems
        xf = x.reshape(-1)
        if n_pad != n:
            xf = jnp.pad(xf, (0, n_pad - n))
        x2d = xf.reshape(n_pad // _LANES, _LANES)
        grid = (x2d.shape[0] // _ROW_TILE,)

        out2d = pl.pallas_call(
            _hardsigmoid_kernel,
            out_shape=jax.ShapeDtypeStruct(x2d.shape, dtype),
            grid=grid,
            in_specs=[pl.BlockSpec((_ROW_TILE, _LANES), lambda i: (i, 0))],
            out_specs=pl.BlockSpec((_ROW_TILE, _LANES), lambda i: (i, 0)),
            compiler_params=pltpu.CompilerParams(
                dimension_semantics=("parallel",)),
        )(x2d)

    return out2d.reshape(-1)[:n].reshape(orig_shape)


if __name__ == "__main__":
    key = jax.random.PRNGKey(0)
    # Matches the module's input: torch.randn([1, 288, 1, 1])
    x114 = jax.random.normal(key, (1, 288, 1, 1), dtype=jnp.float32)

    x115 = hardsigmoid(x114)
    jax.block_until_ready(x115)

    # Reference check (plain JAX)
    ref = jnp.clip(x114 / 6.0 + 0.5, 0.0, 1.0)
    assert x115.shape == (1, 288, 1, 1)
    assert x115.dtype == x114.dtype
    assert jnp.allclose(x115, ref, atol=1e-6), "mismatch vs reference"

    print("KERNEL_OK")
</pallas_src>

<mosaic_0001>
module attributes {stable_mosaic.version = 11 : i64} {
  func.func @_hardsigmoid_kernel(%arg0: memref<8x128xf32, #tpu.memory_space<vmem>>, %arg1: memref<8x128xf32, #tpu.memory_space<vmem>>) attributes {dimension_semantics = [], scalar_prefetch = 0 : i64, scratch_operands = 0 : i64, tpu.core_type = #tpu.core_type<tc>} {
    %c0 = arith.constant 0 : index
    %c0_0 = arith.constant 0 : index
    %0 = vector.load %arg0[%c0, %c0_0] : memref<8x128xf32, #tpu.memory_space<vmem>>, vector<8x128xf32>
    %cst = arith.constant 0.166666672 : f32
    %1 = vector.broadcast %cst : f32 to vector<8x128xf32>
    %2 = arith.mulf %0, %1 : vector<8x128xf32>
    %cst_1 = arith.constant 5.000000e-01 : f32
    %3 = vector.broadcast %cst_1 : f32 to vector<8x128xf32>
    %4 = arith.addf %2, %3 : vector<8x128xf32>
    %cst_2 = arith.constant 0.000000e+00 : f32
    %cst_3 = arith.constant 1.000000e+00 : f32
    %5 = vector.broadcast %cst_2 : f32 to vector<8x128xf32>
    %6 = arith.maximumf %5, %4 : vector<8x128xf32>
    %7 = vector.broadcast %cst_3 : f32 to vector<8x128xf32>
    %8 = arith.minimumf %7, %6 : vector<8x128xf32>
    %c0_4 = arith.constant 0 : index
    %c0_5 = arith.constant 0 : index
    %9 = vector.load %arg1[%c0_4, %c0_5] : memref<8x128xf32, #tpu.memory_space<vmem>>, vector<8x128xf32>
    tpu.vector_store %arg1[%c0_4, %c0_5], %8 {strides = array<i32>} : memref<8x128xf32, #tpu.memory_space<vmem>>, vector<8x128xf32>,
    return
  }
}

</mosaic_0001>

<bundles_post_ra>
// kernel: tpu_custom_call.1
= control target key start
LH: loop header
LB: loop body
LE: loop exit
PB: predicated region body
PF: predicated region fallthrough
CT: control target
= control target key end

     0   :  { %6 = vsyncpa [#allocation3], 0  ;;  %s128_s0 = inlined_call_operand.hbm [shape: f32[8,128], index: 0, kind: input, shape index: {}]   ;;  %s129_s1 = inlined_call_operand.hbm [shape: f32[8,128], index: 1, kind: output, shape index: {}]  }
   0x1   :  { %7 = vsyncpa [#allocation4], 0  ;;  %s92_s6 = smov [#allocation2]   ;;  %s44_s10 = scalar_lea.hbm %s128_s0, 128 }
   0x2   :  { %s14_s7 = sshll.u32 %s92_s6, 4  ;;  %p45_p0 = scmp.ne.s32.totalorder %s128_s0, %s44_s10  ;;  %s15_s7 = int_to_ptr.vmem [resolvable:$true] %s14_s7 }
   0x3   :  { %p48_p1 = scmp.lt.u32.totalorder %s44_s10, %s128_s0 }
   0x5   :  { %p50_p2 = pnand %p48_p1, %p45_p0 }
   0x7   :  { %53 = shalt.err (!%p50_p2)
}
   0x8   :  { %s54_s15 = scalar_lea.vmem %s15_s7, 128  ;;  %p59_p4 = scmp.lt.s32.totalorder %s15_s7, %s15_s7 }
   0x9   :  { %p55_p3 = scmp.ne.s32.totalorder %s15_s7, %s54_s15  ;;  %p60_p5 = scmp.lt.s32.totalorder %s54_s15, %s54_s15 }
   0xb   :  { %p61_p6 = por %p60_p5, %p59_p4 }
   0xd   :  { %p62_p7 = pnand %p61_p6, %p55_p3 }
   0xf   :  { %65 = shalt.err (!%p62_p7)
}
  0x10   :  { %17 = dma.hbm_to_vmem [thread:$0]  %s128_s0, 128, %s15_s7, [#allocation3]  }
  0x11   :  { %88 = dma.done.wait [#allocation3], 128  }
  0x12   :  { %89 = vsyncadd [#allocation3], 4294967168  ;;  %v21_v0 = vld [vmem:[#allocation2] sm:$0xff]  ;;  %s93_s18 = smov [#allocation5]  }
  0x13   :  { %v22_v1 = vmul.f32 0.16666667, %v21_v0  ;;  %s33_s19 = sshll.u32 %s93_s18, 4  ;;  %s34_s19 = int_to_ptr.vmem [resolvable:$true] %s33_s19 }
  0x14   :  { %s66_s20 = scalar_lea.vmem %s34_s19, 128  ;;  %p71_p9 = scmp.lt.s32.totalorder %s34_s19, %s34_s19 }
  0x15   :  { %v23_v2 = vadd.f32 0.5, %v22_v1  ;;  %p67_p8 = scmp.ne.s32.totalorder %s34_s19, %s66_s20  ;;  %p72_p10 = scmp.lt.s32.totalorder %s66_s20, %s66_s20 }
  0x17   :  { %v24_v3 = vmax.f32 %v23_v2, 0.0  ;;  %p73_p11 = por %p72_p10, %p71_p9 }
  0x19   :  { %v25_v4 = vmin.f32 %v24_v3, 1.0  ;;  %p74_p12 = pnand %p73_p11, %p67_p8 }
  0x1b   :  { %26 = vst [vmem:[#allocation5] sm:$0xff] %v25_v4 }
  0x1c   :  { %77 = shalt.err (!%p74_p12)
}
  0x1d   :  { %s78_s22 = scalar_lea.hbm %s129_s1, 128 }
  0x1e   :  { %p79_p13 = scmp.ne.s32.totalorder %s129_s1, %s78_s22  ;;  %p82_p0 = scmp.lt.u32.totalorder %s78_s22, %s129_s1 }
  0x20   :  { %p84_p1 = pnand %p82_p0, %p79_p13 }
  0x22   :  { %87 = shalt.err (!%p84_p1)
}
  0x23   :  { %36 = dma.vmem_to_hbm [thread:$0]  %s34_s19, 128, %s129_s1, [#allocation4]  }
  0x24   :  { %90 = dma.done.wait [#allocation4], 128  }
  0x25   :  { %91 = vsyncadd [#allocation4], 4294967168 }
  0x26   :  { %40 = vsyncpa [#allocation3], 1 }
  0x27   :  { %41 = vsyncpa [#allocation4], 1 }

</bundles_post_ra>
